<compile_context>
chip_gen: v7x
topology: tpu7x:2x2x1
jax: 0.10.0
libtpu: 0.0.40
codegen_flags: <defaults>
</compile_context>

<pallas_src>
from functools import partial
from typing import Optional

import numpy as np
import jax
import jax.numpy as jnp
from jax.experimental import pallas as pl
from jax.experimental.pallas import tpu as pltpu


# ----------------------------------------------------------------------------
# Filter construction (faithful numpy port of get_kernel from the module).
# ----------------------------------------------------------------------------
def get_kernel(factor: int, kernel_type: str, phase: float, kernel_width: int,
               support: Optional[int] = None, sigma: Optional[float] = None) -> np.ndarray:
    if kernel_type not in ["lanczos", "gauss", "box"]:
        raise ValueError()
    if phase == 0.5 and kernel_type != "box":
        kernel = np.zeros([kernel_width - 1, kernel_width - 1])
    else:
        kernel = np.zeros([kernel_width, kernel_width])
    if kernel_type == "box":
        if phase != 0.5:
            raise ValueError("Box filter is always half-phased")
        kernel[:] = 1.0 / (kernel_width * kernel_width)
    elif kernel_type == "gauss":
        if sigma is None:
            raise ValueError("sigma is not specified")
        if phase == 0.5:
            raise ValueError("phase 1/2 for gauss not implemented")
        center = (kernel_width + 1.0) / 2.0
        sigma_sq = sigma * sigma
        for i in range(1, kernel.shape[0] + 1):
            for j in range(1, kernel.shape[1] + 1):
                di = (i - center) / 2.0
                dj = (j - center) / 2.0
                kernel[i - 1][j - 1] = np.exp(-(di * di + dj * dj) / (2 * sigma_sq))
                kernel[i - 1][j - 1] = kernel[i - 1][j - 1] / (2.0 * np.pi * sigma_sq)
    elif kernel_type == "lanczos":
        if support is None:
            raise ValueError("support is not specified")
        center = (kernel_width + 1) / 2.0
        for i in range(1, kernel.shape[0] + 1):
            for j in range(1, kernel.shape[1] + 1):
                if phase == 0.5:
                    di = abs(i + 0.5 - center) / factor
                    dj = abs(j + 0.5 - center) / factor
                else:
                    di = abs(i - center) / factor
                    dj = abs(j - center) / factor
                val = 1
                if di != 0:
                    val = val * support * np.sin(np.pi * di) * np.sin(np.pi * di / support)
                    val = val / (np.pi * np.pi * di * di)
                if dj != 0:
                    val = val * support * np.sin(np.pi * dj) * np.sin(np.pi * dj / support)
                    val = val / (np.pi * np.pi * dj * dj)
                kernel[i - 1][j - 1] = val
    else:
        raise ValueError("wrong method name")
    kernel /= kernel.sum()
    return kernel


# ----------------------------------------------------------------------------
# Small helpers / tiling plan.
# ----------------------------------------------------------------------------
_LANE = 128
_STEP_VMEM_BUDGET = 20 * 1024 * 1024     # double-buffered in+out blocks per step
_VMEM_LIMIT_BYTES = 48 * 1024 * 1024     # <= 64 MiB/core (v7x), well under v5e/v6e
_MAX_HG = 64                             # keeps per-column accumulators in vregs


def _cdiv(a: int, b: int) -> int:
    return -(-a // b)


def _round_up(x: int, m: int) -> int:
    return ((x + m - 1) // m) * m


def _plan(nc, ho, wo, f, kh, kwn):
    """Choose band fold (G), row tiles (T), column tiles (TW) and block sizes."""
    bw = _cdiv(kwn, f)                    # phase-decomposed W taps per column
    q = _cdiv(kh, f) - 1                  # row halo (extra slab rows)
    gmax = max(1, _LANE // nc) if nc < _LANE else 1
    gmax = max(1, min(gmax, _cdiv(ho, 8)))
    tw = 1
    while True:
        wo_t = _cdiv(wo, tw)
        ww_loc = wo_t + bw - 1
        best = None
        hg_cap = max(8, min(_MAX_HG, _round_up(ho, 8)))
        hg = 8
        while hg <= hg_cap:
            r_slab = _round_up(hg + q, 8)
            in_b = ww_loc * f * f * r_slab * _LANE * 4
            out_b = wo_t * hg * _LANE * 4
            step = 2 * (in_b + out_b)                 # double-buffered blocks
            if step <= _STEP_VMEM_BUDGET:
                nb = _cdiv(ho, hg)                    # bands needed
                g = min(gmax, nb)                     # bands folded into lanes
                t = _cdiv(nb, g)                      # grid row tiles
                cbp = _round_up(g * nc, _LANE)
                cost = (t * hg * cbp) / float(ho * nc)  # computed / useful slots
                key = (cost, -hg)
                if best is None or key < best[0]:
                    best = (key, dict(bw=bw, q=q, tw=tw, wo_t=wo_t, ww_loc=ww_loc,
                                      hg=hg, r_slab=r_slab, g=g, t=t, cbp=cbp))
            hg += 8
        if best is not None:
            return best[1]
        if wo_t <= 1:
            raise ValueError("Downsample2: cannot tile the problem into VMEM")
        tw *= 2


# ----------------------------------------------------------------------------
# Pallas kernel: separable, strided, depthwise 2-D correlation.
# ----------------------------------------------------------------------------
def _downsample2_kernel(x_ref, o_ref, *, f, w_groups, h_groups, hg, wo_t):
    """One (row-tile, column-tile, lane-block) grid step.

    x_ref : (Ww_loc, f*f, R_slab, CB)  phase-decomposed input block
            dim0 = output column + W-tap offset (major -> free address offsets)
            dim1 = (ri, s) input phase, dim2 = slab rows (sublanes), dim3 lanes
    o_ref : (Wo_t, Hg, CB)             output block (rows in sublanes)
    w_groups : ((coef, ((b, s), ...)), ...)           shared-value W taps
    h_groups : ((ri, ((coef, (m, ...)), ...)), ...)   per-phase shared H taps
    """
    cb = o_ref.shape[-1]

    def column(wo, carry):
        acc = None
        for ri, hgs in h_groups:
            # ---- 1-D strided W pass for H-phase `ri` (kept in vregs) --------
            tmp = None
            for coef, taps in w_groups:
                part = None
                for (b, sph) in taps:
                    v = x_ref[wo + b, ri * f + sph]          # (R_slab, CB) load
                    part = v if part is None else part + v
                term = part * coef
                tmp = term if tmp is None else tmp + term
            # ---- 1-D H pass over the vreg-resident W-pass result ------------
            for coef, ms in hgs:
                part = None
                for m in ms:
                    sl = tmp[m:m + hg]                       # small sublane shift
                    part = sl if part is None else part + sl
                term = part * coef
                acc = term if acc is None else acc + term
        if acc is None:                                      # unreachable (sum(K)=1)
            acc = jnp.zeros((hg, cb), jnp.float32)
        o_ref[wo] = acc                                      # stored exactly once
        return carry

    jax.lax.fori_loop(0, wo_t, column, 0)


# ----------------------------------------------------------------------------
# Module wrapper.
# ----------------------------------------------------------------------------
class Downsample2Pallas:
    """JAX/Pallas equivalent of torchkit Downsample2 (forward only)."""

    def __init__(self, n_planes: int, factor: int, kernel_type: str, phase: float = 0.0,
                 kernel_width: Optional[int] = None, support: Optional[int] = None,
                 sigma: Optional[float] = None, preserve_size: bool = False):
        if phase not in [0, 0.5]:
            raise ValueError("phase should be 0 or 0.5")
        if kernel_type == "lanczos2":
            support, kernel_width, kernel_type_ = 2, 4 * factor + 1, "lanczos"
        elif kernel_type == "lanczos3":
            support, kernel_width, kernel_type_ = 3, 6 * factor + 1, "lanczos"
        elif kernel_type == "gauss12":
            kernel_width, sigma, kernel_type_ = 7, 1 / 2, "gauss"
        elif kernel_type == "gauss1sq2":
            kernel_width, sigma, kernel_type_ = 9, 1.0 / np.sqrt(2), "gauss"
        elif kernel_type in ["lanczos", "gauss", "box"]:
            kernel_type_ = kernel_type
        else:
            raise ValueError("wrong name kernel")

        self.n_planes = n_planes
        self.factor = factor
        self.kernel = get_kernel(factor, kernel_type_, phase, kernel_width,
                                 support=support, sigma=sigma)
        self.kernel_f32 = jnp.asarray(self.kernel, jnp.float32)
        self.preserve_size = preserve_size
        if preserve_size:
            if self.kernel.shape[0] % 2 == 1:
                self.pad = int((self.kernel.shape[0] - 1) / 2.0)
            else:
                self.pad = int((self.kernel.shape[0] - factor) / 2.0)

        # Exact rank-1 factorization (get_kernel builds an outer product).
        K = self.kernel.astype(np.float64)
        i0, j0 = np.unravel_index(int(np.argmax(np.abs(K))), K.shape)
        kv = K[:, j0].copy()
        kw = K[i0, :] / K[i0, j0]
        assert np.max(np.abs(np.outer(kv, kw) - K)) <= 1e-8 * max(1e-30, float(np.max(np.abs(K)))), \
            "Downsample2 filter is not separable (rank-1) - unexpected for get_kernel()"
        self._kv, self._kw = kv, kw

        f = factor
        kh, kwn = K.shape
        # W-pass taps grouped by shared coefficient (symmetry / box); zeros dropped.
        wmap = {}
        for j in range(kwn):
            c = float(kw[j])
            if c != 0.0:
                wmap.setdefault(c, []).append((j // f, j % f))     # (b, s)
        self._w_groups = tuple((c, tuple(bs)) for c, bs in wmap.items())
        # H-pass taps per phase ri, grouped by shared coefficient; zeros dropped.
        hgs = []
        for ri in range(min(f, kh)):
            n_a = _cdiv(kh - ri, f)
            hmap = {}
            for m in range(n_a):
                c = float(kv[ri + f * m])
                if c != 0.0:
                    hmap.setdefault(c, []).append(m)
            groups = tuple((c, tuple(ms)) for c, ms in hmap.items())
            if groups:
                hgs.append((ri, groups))
        self._h_groups = tuple(hgs)

    def __call__(self, x: jax.Array) -> jax.Array:
        N, C, H, W = x.shape
        if C != self.n_planes:
            raise ValueError("channel mismatch")
        f = self.factor
        kh, kwn = self.kernel.shape
        pad = self.pad if self.preserve_size else 0
        Hp, Wp = H + 2 * pad, W + 2 * pad
        Ho = (Hp - kh) // f + 1
        Wo = (Wp - kwn) // f + 1
        if Ho <= 0 or Wo <= 0:
            raise ValueError("input too small for this kernel/factor")
        NC = N * C

        pl_ = _plan(NC, Ho, Wo, f, kh, kwn)
        TW, T, G = pl_["tw"], pl_["t"], pl_["g"]
        Wo_t, Ww_loc = pl_["wo_t"], pl_["ww_loc"]
        Hg, R_slab, CBp = pl_["hg"], pl_["r_slab"], pl_["cbp"]
        CB = _LANE
        n_cb = CBp // CB

        Hsrc = ((T * G - 1) * Hg + R_slab) * f
        Wsrc = ((TW - 1) * Wo_t + Ww_loc) * f

        # Constant gather tables: bands (rows folded into lanes / row tiles) and
        # column tiles (with their tiny duplicated W halo).
        rows = (((np.arange(T)[:, None, None, None] * G
                  + np.arange(G)[None, :, None, None]) * Hg
                 + np.arange(R_slab)[None, None, :, None]) * f
                + np.arange(f)[None, None, None, :])
        cols = ((np.arange(TW)[:, None, None] * Wo_t
                 + np.arange(Ww_loc)[None, :, None]) * f
                + np.arange(f)[None, None, :])
        rows = jnp.asarray(rows.reshape(-1), jnp.int32)
        cols = jnp.asarray(cols.reshape(-1), jnp.int32)

        kernel_fn = partial(_downsample2_kernel, f=f, w_groups=self._w_groups,
                            h_groups=self._h_groups, hg=Hg, wo_t=Wo_t)

        grid_spec = pltpu.PrefetchScalarGridSpec(
            num_scalar_prefetch=0,
            grid=(T, TW, n_cb),
            in_specs=[pl.BlockSpec((Ww_loc, f * f, R_slab, CB),
                                   lambda t, tw, c: (tw, 0, t, c))],
            out_specs=pl.BlockSpec((Wo_t, Hg, CB), lambda t, tw, c: (tw, t, c)),
        )
        cparams = pltpu.CompilerParams(
            dimension_semantics=("parallel", "parallel", "parallel"),
            vmem_limit_bytes=_VMEM_LIMIT_BYTES,
        )
        call = pl.pallas_call(
            kernel_fn,
            out_shape=jax.ShapeDtypeStruct((TW * Wo_t, T * Hg, CBp), jnp.float32),
            grid_spec=grid_spec,
            compiler_params=cparams,
        )

        def _fwd(xin):
            xs = xin.astype(jnp.float32)
            if pad:
                xs = jnp.pad(xs, ((0, 0), (0, 0), (pad, pad), (pad, pad)), mode="edge")
            xs = xs[:, :, :min(Hp, Hsrc), :min(Wp, Wsrc)]
            ph, pw = Hsrc - xs.shape[2], Wsrc - xs.shape[3]
            if ph or pw:
                xs = jnp.pad(xs, ((0, 0), (0, 0), (0, ph), (0, pw)))
            # phase / band / tile gather -> lane-dense kernel layout
            xg = jnp.take(xs, rows, axis=2)
            xg = jnp.take(xg, cols, axis=3)
            xg = xg.reshape(N, C, T, G, R_slab, f, TW, Ww_loc, f)
            x6 = xg.transpose(6, 7, 5, 8, 2, 4, 3, 0, 1)
            x6 = x6.reshape(TW * Ww_loc, f * f, T * R_slab, G * NC)
            if CBp > G * NC:
                x6 = jnp.pad(x6, ((0, 0), (0, 0), (0, 0), (0, CBp - G * NC)))
            o = call(x6)
            # un-band / un-tile, back to NCHW
            o = o[:, :, :G * NC].reshape(TW, Wo_t, T, Hg, G, N, C)
            o = o.transpose(5, 6, 2, 4, 3, 0, 1).reshape(N, C, T * G * Hg, TW * Wo_t)
            return o[:, :, :Ho, :Wo]

        return jax.jit(_fwd)(x)


# ----------------------------------------------------------------------------
# Plain-JAX reference (depthwise conv, identical semantics to the PyTorch conv).
# ----------------------------------------------------------------------------
def _reference(down: Downsample2Pallas, x: jax.Array) -> jax.Array:
    N, C, H, W = x.shape
    f = down.factor
    x = x.astype(jnp.float32)
    if down.preserve_size:
        p = down.pad
        x = jnp.pad(x, ((0, 0), (0, 0), (p, p), (p, p)), mode="edge")
    w = jnp.zeros((C, 1) + down.kernel.shape, jnp.float32).at[:, 0].set(down.kernel_f32)
    return jax.lax.conv_general_dilated(
        x, w, window_strides=(f, f), padding="VALID",
        dimension_numbers=("NCHW", "OIHW", "NCHW"), feature_group_count=C)


if __name__ == "__main__":
    key = jax.random.PRNGKey(0)
    N, C, H, W = 2, 4, 16, 16
    x = jax.random.normal(key, (N, C, H, W), dtype=jnp.float32)

    # Config 1: gauss12, factor=2, preserve_size=True  -> output spatial = 8x8
    down1 = Downsample2Pallas(n_planes=C, factor=2, kernel_type="gauss12",
                              phase=0.0, preserve_size=True)
    y1 = down1(x)
    jax.block_until_ready(y1)
    assert y1.shape == (N, C, H // 2, W // 2), y1.shape
    np.testing.assert_allclose(np.asarray(y1), np.asarray(_reference(down1, x)),
                               rtol=1e-4, atol=1e-4)

    # Config 2: lanczos2, factor=2, phase=0.5 (even 8x8 filter), no padding -> 5x5
    down2 = Downsample2Pallas(n_planes=C, factor=2, kernel_type="lanczos2",
                              phase=0.5, preserve_size=False)
    y2 = down2(x)
    jax.block_until_ready(y2)
    assert y2.shape == (N, C, 5, 5), y2.shape
    np.testing.assert_allclose(np.asarray(y2), np.asarray(_reference(down2, x)),
                               rtol=1e-4, atol=1e-4)

    print("KERNEL_OK")
</pallas_src>

<mosaic_0001>
module attributes {stable_mosaic.version = 11 : i64} {
  func.func @_downsample2_kernel(%arg0: i32, %arg1: i32, %arg2: i32, %arg3: memref<11x4x16x128xf32, #tpu.memory_space<vmem>>, %arg4: memref<8x8x128xf32, #tpu.memory_space<vmem>>) attributes {dimension_semantics = [#tpu.dimension_semantics<parallel>, #tpu.dimension_semantics<parallel>, #tpu.dimension_semantics<parallel>], iteration_bounds = array<i64: 1, 1, 1>, scalar_prefetch = 0 : i64, scratch_operands = 0 : i64, tpu.core_type = #tpu.core_type<tc>, window_params = [{transform_indices = @transform_0, window_bounds = array<i64: 11, 4, 16, 128>}, {transform_indices = @transform_1, window_bounds = array<i64: 8, 8, 128>}]} {
    %c0_i32 = arith.constant 0 : i32
    %c8_i32 = arith.constant 8 : i32
    %0 = arith.addi %c0_i32, %c8_i32 : i32
    %c1_i32 = arith.constant 1 : i32
    scf.for %arg5 = %c0_i32 to %0 step %c1_i32  : i32 {
      %c0_i32_1 = arith.constant 0 : i32
      %1 = arith.addi %arg5, %c0_i32_1 : i32
      %2 = arith.index_cast %1 : i32 to index
      %c0 = arith.constant 0 : index
      %c0_2 = arith.constant 0 : index
      %c0_3 = arith.constant 0 : index
      %3 = vector.load %arg3[%2, %c0, %c0_2, %c0_3] : memref<11x4x16x128xf32, #tpu.memory_space<vmem>>, vector<1x1x16x128xf32>
      %4 = vector.shape_cast %3 : vector<1x1x16x128xf32> to vector<16x128xf32>
      %c3_i32 = arith.constant 3 : i32
      %5 = arith.addi %arg5, %c3_i32 : i32
      %6 = arith.index_cast %5 : i32 to index
      %c0_4 = arith.constant 0 : index
      %c0_5 = arith.constant 0 : index
      %c0_6 = arith.constant 0 : index
      %7 = vector.load %arg3[%6, %c0_4, %c0_5, %c0_6] : memref<11x4x16x128xf32, #tpu.memory_space<vmem>>, vector<1x1x16x128xf32>
      %8 = vector.shape_cast %7 : vector<1x1x16x128xf32> to vector<16x128xf32>
      %9 = arith.addf %4, %8 : vector<16x128xf32>
      %cst = arith.constant 0.0111089963 : f32
      %10 = vector.broadcast %cst : f32 to vector<16x128xf32>
      %11 = arith.mulf %9, %10 : vector<16x128xf32>
      %c0_i32_7 = arith.constant 0 : i32
      %12 = arith.addi %arg5, %c0_i32_7 : i32
      %13 = arith.index_cast %12 : i32 to index
      %c1 = arith.constant 1 : index
      %c0_8 = arith.constant 0 : index
      %c0_9 = arith.constant 0 : index
      %14 = vector.load %arg3[%13, %c1, %c0_8, %c0_9] : memref<11x4x16x128xf32, #tpu.memory_space<vmem>>, vector<1x1x16x128xf32>
      %15 = vector.shape_cast %14 : vector<1x1x16x128xf32> to vector<16x128xf32>
      %c2_i32 = arith.constant 2 : i32
      %16 = arith.addi %arg5, %c2_i32 : i32
      %17 = arith.index_cast %16 : i32 to index
      %c1_10 = arith.constant 1 : index
      %c0_11 = arith.constant 0 : index
      %c0_12 = arith.constant 0 : index
      %18 = vector.load %arg3[%17, %c1_10, %c0_11, %c0_12] : memref<11x4x16x128xf32, #tpu.memory_space<vmem>>, vector<1x1x16x128xf32>
      %19 = vector.shape_cast %18 : vector<1x1x16x128xf32> to vector<16x128xf32>
      %20 = arith.addf %15, %19 : vector<16x128xf32>
      %cst_13 = arith.constant 0.135335281 : f32
      %21 = vector.broadcast %cst_13 : f32 to vector<16x128xf32>
      %22 = arith.mulf %20, %21 : vector<16x128xf32>
      %23 = arith.addf %11, %22 : vector<16x128xf32>
      %c1_i32_14 = arith.constant 1 : i32
      %24 = arith.addi %arg5, %c1_i32_14 : i32
      %25 = arith.index_cast %24 : i32 to index
      %c0_15 = arith.constant 0 : index
      %c0_16 = arith.constant 0 : index
      %c0_17 = arith.constant 0 : index
      %26 = vector.load %arg3[%25, %c0_15, %c0_16, %c0_17] : memref<11x4x16x128xf32, #tpu.memory_space<vmem>>, vector<1x1x16x128xf32>
      %27 = vector.shape_cast %26 : vector<1x1x16x128xf32> to vector<16x128xf32>
      %c2_i32_18 = arith.constant 2 : i32
      %28 = arith.addi %arg5, %c2_i32_18 : i32
      %29 = arith.index_cast %28 : i32 to index
      %c0_19 = arith.constant 0 : index
      %c0_20 = arith.constant 0 : index
      %c0_21 = arith.constant 0 : index
      %30 = vector.load %arg3[%29, %c0_19, %c0_20, %c0_21] : memref<11x4x16x128xf32, #tpu.memory_space<vmem>>, vector<1x1x16x128xf32>
      %31 = vector.shape_cast %30 : vector<1x1x16x128xf32> to vector<16x128xf32>
      %32 = arith.addf %27, %31 : vector<16x128xf32>
      %cst_22 = arith.constant 0.606530666 : f32
      %33 = vector.broadcast %cst_22 : f32 to vector<16x128xf32>
      %34 = arith.mulf %32, %33 : vector<16x128xf32>
      %35 = arith.addf %23, %34 : vector<16x128xf32>
      %c1_i32_23 = arith.constant 1 : i32
      %36 = arith.addi %arg5, %c1_i32_23 : i32
      %37 = arith.index_cast %36 : i32 to index
      %c1_24 = arith.constant 1 : index
      %c0_25 = arith.constant 0 : index
      %c0_26 = arith.constant 0 : index
      %38 = vector.load %arg3[%37, %c1_24, %c0_25, %c0_26] : memref<11x4x16x128xf32, #tpu.memory_space<vmem>>, vector<1x1x16x128xf32>
      %39 = vector.shape_cast %38 : vector<1x1x16x128xf32> to vector<16x128xf32>
      %cst_27 = arith.constant 1.000000e+00 : f32
      %40 = vector.broadcast %cst_27 : f32 to vector<16x128xf32>
      %41 = arith.mulf %39, %40 : vector<16x128xf32>
      %42 = arith.addf %35, %41 : vector<16x128xf32>
      %43 = vector.extract_strided_slice %42 {offsets = [0, 0], sizes = [8, 128], strides = [1, 1]} : vector<16x128xf32> to vector<8x128xf32>
      %44 = vector.extract_strided_slice %42 {offsets = [3, 0], sizes = [8, 128], strides = [1, 1]} : vector<16x128xf32> to vector<8x128xf32>
      %45 = arith.addf %43, %44 : vector<8x128xf32>
      %cst_28 = arith.constant 0.00176900916 : f32
      %46 = vector.broadcast %cst_28 : f32 to vector<8x128xf32>
      %47 = arith.mulf %45, %46 : vector<8x128xf32>
      %48 = vector.extract_strided_slice %42 {offsets = [1, 0], sizes = [8, 128], strides = [1, 1]} : vector<16x128xf32> to vector<8x128xf32>
      %49 = vector.extract_strided_slice %42 {offsets = [2, 0], sizes = [8, 128], strides = [1, 1]} : vector<16x128xf32> to vector<8x128xf32>
      %50 = arith.addf %48, %49 : vector<8x128xf32>
      %cst_29 = arith.constant 0.0965846255 : f32
      %51 = vector.broadcast %cst_29 : f32 to vector<8x128xf32>
      %52 = arith.mulf %50, %51 : vector<8x128xf32>
      %53 = arith.addf %47, %52 : vector<8x128xf32>
      %c0_i32_30 = arith.constant 0 : i32
      %54 = arith.addi %arg5, %c0_i32_30 : i32
      %55 = arith.index_cast %54 : i32 to index
      %c2 = arith.constant 2 : index
      %c0_31 = arith.constant 0 : index
      %c0_32 = arith.constant 0 : index
      %56 = vector.load %arg3[%55, %c2, %c0_31, %c0_32] : memref<11x4x16x128xf32, #tpu.memory_space<vmem>>, vector<1x1x16x128xf32>
      %57 = vector.shape_cast %56 : vector<1x1x16x128xf32> to vector<16x128xf32>
      %c3_i32_33 = arith.constant 3 : i32
      %58 = arith.addi %arg5, %c3_i32_33 : i32
      %59 = arith.index_cast %58 : i32 to index
      %c2_34 = arith.constant 2 : index
      %c0_35 = arith.constant 0 : index
      %c0_36 = arith.constant 0 : index
      %60 = vector.load %arg3[%59, %c2_34, %c0_35, %c0_36] : memref<11x4x16x128xf32, #tpu.memory_space<vmem>>, vector<1x1x16x128xf32>
      %61 = vector.shape_cast %60 : vector<1x1x16x128xf32> to vector<16x128xf32>
      %62 = arith.addf %57, %61 : vector<16x128xf32>
      %cst_37 = arith.constant 0.0111089963 : f32
      %63 = vector.broadcast %cst_37 : f32 to vector<16x128xf32>
      %64 = arith.mulf %62, %63 : vector<16x128xf32>
      %c0_i32_38 = arith.constant 0 : i32
      %65 = arith.addi %arg5, %c0_i32_38 : i32
      %66 = arith.index_cast %65 : i32 to index
      %c3 = arith.constant 3 : index
      %c0_39 = arith.constant 0 : index
      %c0_40 = arith.constant 0 : index
      %67 = vector.load %arg3[%66, %c3, %c0_39, %c0_40] : memref<11x4x16x128xf32, #tpu.memory_space<vmem>>, vector<1x1x16x128xf32>
      %68 = vector.shape_cast %67 : vector<1x1x16x128xf32> to vector<16x128xf32>
      %c2_i32_41 = arith.constant 2 : i32
      %69 = arith.addi %arg5, %c2_i32_41 : i32
      %70 = arith.index_cast %69 : i32 to index
      %c3_42 = arith.constant 3 : index
      %c0_43 = arith.constant 0 : index
      %c0_44 = arith.constant 0 : index
      %71 = vector.load %arg3[%70, %c3_42, %c0_43, %c0_44] : memref<11x4x16x128xf32, #tpu.memory_space<vmem>>, vector<1x1x16x128xf32>
      %72 = vector.shape_cast %71 : vector<1x1x16x128xf32> to vector<16x128xf32>
      %73 = arith.addf %68, %72 : vector<16x128xf32>
      %cst_45 = arith.constant 0.135335281 : f32
      %74 = vector.broadcast %cst_45 : f32 to vector<16x128xf32>
      %75 = arith.mulf %73, %74 : vector<16x128xf32>
      %76 = arith.addf %64, %75 : vector<16x128xf32>
      %c1_i32_46 = arith.constant 1 : i32
      %77 = arith.addi %arg5, %c1_i32_46 : i32
      %78 = arith.index_cast %77 : i32 to index
      %c2_47 = arith.constant 2 : index
      %c0_48 = arith.constant 0 : index
      %c0_49 = arith.constant 0 : index
      %79 = vector.load %arg3[%78, %c2_47, %c0_48, %c0_49] : memref<11x4x16x128xf32, #tpu.memory_space<vmem>>, vector<1x1x16x128xf32>
      %80 = vector.shape_cast %79 : vector<1x1x16x128xf32> to vector<16x128xf32>
      %c2_i32_50 = arith.constant 2 : i32
      %81 = arith.addi %arg5, %c2_i32_50 : i32
      %82 = arith.index_cast %81 : i32 to index
      %c2_51 = arith.constant 2 : index
      %c0_52 = arith.constant 0 : index
      %c0_53 = arith.constant 0 : index
      %83 = vector.load %arg3[%82, %c2_51, %c0_52, %c0_53] : memref<11x4x16x128xf32, #tpu.memory_space<vmem>>, vector<1x1x16x128xf32>
      %84 = vector.shape_cast %83 : vector<1x1x16x128xf32> to vector<16x128xf32>
      %85 = arith.addf %80, %84 : vector<16x128xf32>
      %cst_54 = arith.constant 0.606530666 : f32
      %86 = vector.broadcast %cst_54 : f32 to vector<16x128xf32>
      %87 = arith.mulf %85, %86 : vector<16x128xf32>
      %88 = arith.addf %76, %87 : vector<16x128xf32>
      %c1_i32_55 = arith.constant 1 : i32
      %89 = arith.addi %arg5, %c1_i32_55 : i32
      %90 = arith.index_cast %89 : i32 to index
      %c3_56 = arith.constant 3 : index
      %c0_57 = arith.constant 0 : index
      %c0_58 = arith.constant 0 : index
      %91 = vector.load %arg3[%90, %c3_56, %c0_57, %c0_58] : memref<11x4x16x128xf32, #tpu.memory_space<vmem>>, vector<1x1x16x128xf32>
      %92 = vector.shape_cast %91 : vector<1x1x16x128xf32> to vector<16x128xf32>
      %cst_59 = arith.constant 1.000000e+00 : f32
      %93 = vector.broadcast %cst_59 : f32 to vector<16x128xf32>
      %94 = arith.mulf %92, %93 : vector<16x128xf32>
      %95 = arith.addf %88, %94 : vector<16x128xf32>
      %96 = vector.extract_strided_slice %95 {offsets = [0, 0], sizes = [8, 128], strides = [1, 1]} : vector<16x128xf32> to vector<8x128xf32>
      %97 = vector.extract_strided_slice %95 {offsets = [2, 0], sizes = [8, 128], strides = [1, 1]} : vector<16x128xf32> to vector<8x128xf32>
      %98 = arith.addf %96, %97 : vector<8x128xf32>
      %cst_60 = arith.constant 0.0215509422 : f32
      %99 = vector.broadcast %cst_60 : f32 to vector<8x128xf32>
      %100 = arith.mulf %98, %99 : vector<8x128xf32>
      %101 = arith.addf %53, %100 : vector<8x128xf32>
      %102 = vector.extract_strided_slice %95 {offsets = [1, 0], sizes = [8, 128], strides = [1, 1]} : vector<16x128xf32> to vector<8x128xf32>
      %cst_61 = arith.constant 0.159241125 : f32
      %103 = vector.broadcast %cst_61 : f32 to vector<8x128xf32>
      %104 = arith.mulf %102, %103 : vector<8x128xf32>
      %105 = arith.addf %101, %104 : vector<8x128xf32>
      %106 = arith.index_cast %arg5 : i32 to index
      %c0_62 = arith.constant 0 : index
      %c0_63 = arith.constant 0 : index
      %107 = vector.load %arg4[%106, %c0_62, %c0_63] : memref<8x8x128xf32, #tpu.memory_space<vmem>>, vector<1x8x128xf32>
      %108 = vector.shape_cast %107 : vector<1x8x128xf32> to vector<8x128xf32>
      %109 = vector.shape_cast %105 : vector<8x128xf32> to vector<1x8x128xf32>
      tpu.vector_store %arg4[%106, %c0_62, %c0_63], %109 {strides = array<i32>} : memref<8x8x128xf32, #tpu.memory_space<vmem>>, vector<1x8x128xf32>,
    }
    %c8_i32_0 = arith.constant 8 : i32
    return
  }
  func.func @transform_0(%arg0: i32, %arg1: i32, %arg2: i32) -> (i32, i32, i32, i32) {
    %c0_i32 = arith.constant 0 : i32
    %c0_i32_0 = arith.constant 0 : i32
    return %arg1, %c0_i32, %arg0, %arg2 : i32, i32, i32, i32
  }
  func.func @transform_1(%arg0: i32, %arg1: i32, %arg2: i32) -> (i32, i32, i32) {
    %c0_i32 = arith.constant 0 : i32
    return %arg1, %arg0, %arg2 : i32, i32, i32
  }
}

</mosaic_0001>

<bundles_post_ra>
// kernel: _fwd.1
= control target key start
LH: loop header
LB: loop body
LE: loop exit
PB: predicated region body
PF: predicated region fallthrough
CT: control target
= control target key end

     0   :  { %s276_s6 = smov 0   ;;  %s325_s0 = inlined_call_operand.vmem [shape: f32[11,4,16,128], index: 0, kind: input, shape index: {}]   ;;  %s326_s1 = inlined_call_operand.vmem [shape: f32[8,8,128], index: 1, kind: output, shape index: {}]  }
   0x1 LB: > { %s209_s7 = sshll.u32 %s264_s6, 6  ;;  %vm65_vm0 = vcmask 1044480   ;;  %vm72_vm1 = vcmask 1046528   ;;  %vm137_vm2 = vcmask 1045504   ;;  %s249_s11 = sshll.u32 %s264_s6, 3  ;;  %s264_s6 = sphi %s276_s6, %s13_s6  }
   0x2   : > { %s285_s10 = scalar_lea.vmem %s325_s0, %s209_s7  ;;  %s155_s14 = scalar_lea.vmem %s326_s1, %s249_s11 }
   0x3   : > { %v16_v0 = vld [vmem:[%s285_s10] sm:$0xff]  ;;  %v17_v1 = vld [vmem:[%s285_s10 + $0x8] sm:$0xff]  ;;  %v214_v5 = vld [vmem:[%s285_s10 + $0x10] sm:$0xff]  ;;  %s13_s6 = sadd.s32 1, %s264_s6  }
   0x4   : > { %v211_v2 = vld [vmem:[%s285_s10 + $0xc0] sm:$0xff]  ;;  %v212_v3 = vld [vmem:[%s285_s10 + $0xc8] sm:$0xff]  ;;  %v215_v6 = vld [vmem:[%s285_s10 + $0x18] sm:$0xff]  ;;  %p10_p0 = scmp.ge.s32.totalorder %s13_s6, 8  }
   0x5   : > { %v23_v4 = vadd.f32 %v211_v2, %v16_v0  ;;  %v24_v7 = vadd.f32 %v212_v3, %v17_v1  ;;  %v217_v8 = vld [vmem:[%s285_s10 + $0x90] sm:$0xff]  ;;  %v218_v9 = vld [vmem:[%s285_s10 + $0x98] sm:$0xff]  ;;  %v220_v10 = vld [vmem:[%s285_s10 + $0x40] sm:$0xff] }
   0x6   : > { %v37_v12 = vadd.f32 %v217_v8, %v214_v5  ;;  %v38_v13 = vadd.f32 %v218_v9, %v215_v6  ;;  %v221_v14 = vld [vmem:[%s285_s10 + $0x48] sm:$0xff]  ;;  %v223_v15 = vld [vmem:[%s285_s10 + $0x80] sm:$0xff]  ;;  %v226_v27 = vld [vmem:[%s285_s10 + $0x50] sm:$0xff] }
   0x7   : > { %v25_v11 = vmul.f32 0.011108996, %v23_v4  ;;  %v224_v16 = vld [vmem:[%s285_s10 + $0x88] sm:$0xff]  ;;  %v26_v17 = vmul.f32 0.011108996, %v24_v7  ;;  %v51_v18 = vadd.f32 %v223_v15, %v220_v10  ;;  %v229_v20 = vld [vmem:[%s285_s10 + $0x20] sm:$0xff] }
   0x8   : > { %v52_v19 = vadd.f32 %v224_v16, %v221_v14  ;;  %v39_v21 = vmul.f32 0.13533528, %v37_v12  ;;  %v40_v22 = vmul.f32 0.13533528, %v38_v13  ;;  %v230_v23 = vld [vmem:[%s285_s10 + $0x28] sm:$0xff]  ;;  %v232_v24 = vld [vmem:[%s285_s10 + $0xe0] sm:$0xff] }
   0x9   : > { %v53_v25 = vmul.f32 0.60653067, %v51_v18  ;;  %v227_v28 = vld [vmem:[%s285_s10 + $0x58] sm:$0xff]  ;;  %v233_v29 = vld [vmem:[%s285_s10 + $0xe8] sm:$0xff]  ;;  %v97_v30 = vadd.f32 %v232_v24, %v229_v20  ;;  %v235_v31 = vld [vmem:[%s285_s10 + $0x30] sm:$0xff] }
   0xa   : > { %v54_v26 = vmul.f32 0.60653067, %v52_v19  ;;  %v41_v32 = vadd.f32 %v39_v21, %v25_v11  ;;  %v42_v33 = vadd.f32 %v40_v22, %v26_v17  ;;  %v98_v34 = vadd.f32 %v233_v29, %v230_v23  ;;  %v236_v35 = vld [vmem:[%s285_s10 + $0x38] sm:$0xff]  ;;  %v238_v36 = vld [vmem:[%s285_s10 + $0xb0] sm:$0xff]  ;;  %v241_v41 = vld [vmem:[%s285_s10 + $0x60] sm:$0xff] }
   0xb   : > { %v239_v37 = vld [vmem:[%s285_s10 + $0xb8] sm:$0xff]  ;;  %v99_v38 = vmul.f32 0.011108996, %v97_v30  ;;  %v109_v39 = vadd.f32 %v238_v36, %v235_v31  ;;  %v242_v42 = vld [vmem:[%s285_s10 + $0x68] sm:$0xff]  ;;  %v244_v43 = vld [vmem:[%s285_s10 + $0xa0] sm:$0xff] }
   0xc   : > { %v110_v40 = vadd.f32 %v239_v37, %v236_v35  ;;  %v55_v44 = vadd.f32 %v53_v25, %v41_v32  ;;  %v56_v45 = vadd.f32 %v54_v26, %v42_v33  ;;  %v100_v46 = vmul.f32 0.011108996, %v98_v34  ;;  %v245_v47 = vld [vmem:[%s285_s10 + $0xa8] sm:$0xff]  ;;  %v247_v62 = vld [vmem:[%s285_s10 + $0x70] sm:$0xff]  ;;  %v248_v63 = vld [vmem:[%s285_s10 + $0x78] sm:$0xff] }
   0xd   : > { %v123_v48 = vadd.f32 %v244_v43, %v241_v41  ;;  %v111_v49 = vmul.f32 0.13533528, %v109_v39  ;;  %v124_v51 = vadd.f32 %v245_v47, %v242_v42 }
   0xe   : > { %v112_v50 = vmul.f32 0.13533528, %v110_v40  ;;  %v61_v52 = vadd.f32 %v226_v27, %v55_v44  ;;  %v62_v53 = vadd.f32 %v227_v28, %v56_v45 }
   0xf   : > { %v125_v54 = vmul.f32 0.60653067, %v123_v48  ;;  %v113_v55 = vadd.f32 %v111_v49, %v99_v38  ;;  %v126_v57 = vmul.f32 0.60653067, %v124_v51 }
  0x10   : > { %v114_v56 = vadd.f32 %v112_v50, %v100_v46  ;;  %v66_v58 = vrot.slane %v61_v52, 3  ;;  %v67_v59 = vrot.slane %v62_v53, 3  ;;  %v73_v60 = vrot.slane %v61_v52, 1 }
  0x11   : > { %v74_v61 = vrot.slane %v62_v53, 1  ;;  %v127_v0 = vadd.f32 %v125_v54, %v113_v55 }
  0x12   : > { %v128_v1 = vadd.f32 %v126_v57, %v114_v56  ;;  %v68_v2 = vsel %vm65_vm0, %v66_v58, %v67_v59 }
  0x13   : > { %v75_v3 = vsel %vm72_vm1, %v73_v60, %v74_v61  ;;  %v79_v4 = vadd.f32 %v74_v61, %v62_v53  ;;  %v70_v5 = vadd.f32 %v68_v2, %v61_v52  ;;  %v133_v7 = vadd.f32 %v247_v62, %v127_v0 }
  0x14   : > { %v78_v6 = vadd.f32 %v75_v3, %v61_v52  ;;  %v134_v8 = vadd.f32 %v248_v63, %v128_v1 }
  0x15   : > { %v81_v9 = vmul.f32 0.096584626, %v79_v4  ;;  %v71_v10 = vmul.f32 0.0017690092, %v70_v5  ;;  %v138_v12 = vrot.slane %v133_v7, 2 }
  0x16   : > { %v80_v11 = vmul.f32 0.096584626, %v78_v6  ;;  %v139_v13 = vrot.slane %v134_v8, 2  ;;  %v145_v15 = vmul.f32 0.15924112, %v133_v7 }
  0x17   : > { %v85_v14 = vrot.slane %v81_v9, 1  ;;  %v146_v16 = vmul.f32 0.15924112, %v134_v8 }
  0x18   : > { %v84_v17 = vrot.slane %v80_v11, 1  ;;  %v140_v18 = vsel %vm137_vm2, %v138_v12, %v139_v13  ;;  %v149_v20 = vrot.slane %v145_v15, 1 }
  0x19   : > { %v142_v19 = vadd.f32 %v140_v18, %v133_v7  ;;  %v150_v21 = vrot.slane %v146_v16, 1 }
  0x1a   : > { %v86_v22 = vsel %vm72_vm1, %v84_v17, %v85_v14 }
  0x1b   : > { %v88_v23 = vadd.f32 %v86_v22, %v71_v10  ;;  %v143_v24 = vmul.f32 0.021550942, %v142_v19  ;;  %v151_v25 = vsel %vm72_vm1, %v149_v20, %v150_v21  ;;  %12 = sbr.rel (!%p10_p0) target bundleno = 1 (0x1), region = 46 }
  0x1d   : > { %v144_v26 = vadd.f32 %v143_v24, %v88_v23 }
  0x1f   : > { %v153_v27 = vadd.f32 %v151_v25, %v144_v26 }
  0x21   : > { %156 = vst [vmem:[%s155_s14] sm:$0xff] %v153_v27 }

</bundles_post_ra>
